<compile_context>
chip_gen: v5e
topology: v5e:2x2
jax: 0.10.0
libtpu: 0.0.40
codegen_flags: <defaults>
</compile_context>

<pallas_src>
import math
from functools import partial

import jax
import jax.numpy as jnp
from jax import lax
from jax.experimental import pallas as pl
from jax.experimental.pallas import tpu as pltpu

_LANES = 128


def _bce_with_logits(x, t):
    # numerically stable form, matches torch BCEWithLogitsLoss(reduction='none')
    return jnp.maximum(x, 0.0) - x * t + jnp.log1p(jnp.exp(-jnp.abs(x)))


def _partial_sums_kernel(x_ref, t_ref, part_ref, *, valid_rows):
    """Per-block unweighted partial sums, grouped by (flat_row mod R).

    x_ref/t_ref: (tile, 128) blocks of the row-major flattened inputs.
    part_ref:    (1, R, 128) partial sums, R = lcm(weight row period, 8).
    Per-class weights only depend on (flat_row mod R, lane), so they are
    applied once in the wrapper -- nothing but the two data streams hits HBM.
    """
    tile = x_ref.shape[0]
    r_rows = part_ref.shape[1]
    x = x_ref[...].astype(jnp.float32)
    t = t_ref[...].astype(jnp.float32)
    bce = _bce_with_logits(x, t)
    if valid_rows is not None:
        # ragged last grid block: zero rows past the end of the array.
        # Boundary-block reads are undefined, so select (not multiply) the
        # invalid rows away -- jnp.where discards any NaN/Inf garbage.
        row = (pl.program_id(0) * tile
               + lax.broadcasted_iota(jnp.int32, bce.shape, 0))
        bce = jnp.where(row < valid_rows, bce, 0.0)
    # (tile, 128) -> (tile//R, R, 128), sum leading axis: pure VPU vreg adds,
    # no per-step cross-lane reduce, no loop-carried dependency.
    part_ref[...] = jnp.sum(bce.reshape(-1, r_rows, _LANES), axis=0)[None]


def _round_up(x, m):
    return ((x + m - 1) // m) * m


def _reference_loss(outputs, targets, weights):
    x = outputs.astype(jnp.float32)
    t = targets.astype(jnp.float32)
    w = weights.astype(jnp.float32)
    return jnp.mean(_bce_with_logits(x, t) * w[None, :])


def weighted_multilabel_loss(outputs, targets, weights, *,
                             tile_rows=2048, small_problem_elems=1 << 16):
    """Pallas equivalent of WeightedMultilabel(weights)(outputs, targets).

    outputs/targets may be f32 or bf16 (bf16 halves HBM traffic; the kernel
    upcasts to f32 per tile so accuracy of the accumulation is unchanged).
    """
    N, C = outputs.shape
    assert targets.shape == (N, C)
    assert weights.shape == (C,)
    total = N * C
    w32 = weights.astype(jnp.float32)

    # Row period of the flattened weight pattern, and the partial-sum row
    # count (multiple of 8 so the in-kernel (.., R, 128) regroup is layout-free).
    period = C // math.gcd(C, _LANES)
    r_rows = math.lcm(period, 8)
    align = math.lcm(r_rows, 16)          # 16 keeps bf16 sublane tiling legal

    rows = total // _LANES

    # Small-problem / ragged bypass: a pallas_call is pure overhead for tiny
    # losses, and when N*C % 128 != 0 the lane-dense reshape would need a
    # host-side pad/concat copy (an extra full HBM read+write) -- plain XLA is
    # already near roofline for those cases.
    if (total % _LANES != 0) or (total <= small_problem_elems) or (rows < align):
        return _reference_loss(outputs, targets, weights)

    # Lane-dense flatten is free (row-major contiguous, total % 128 == 0).
    x2 = outputs.reshape(rows, _LANES)
    t2 = targets.reshape(rows, _LANES)

    # Tile selection: as big as requested, but keep num_blocks >= 2 so both
    # v7x TensorCores stream on the "parallel" grid axis.
    tile = min(_round_up(tile_rows, align),
               _round_up(pl.cdiv(rows, 2), align))
    tile = max(tile, align)
    num_blocks = pl.cdiv(rows, tile)
    valid_rows = rows if rows % tile != 0 else None    # mask only if ragged

    data_spec = pl.BlockSpec((tile, _LANES), lambda i: (i, 0))
    out_spec = pl.BlockSpec((1, r_rows, _LANES), lambda i: (i, 0, 0))

    # 2 data streams x 2 pipeline buffers (f32 upper bound) + partials + slack.
    # Set explicitly so large tiles stay safe under v5e's 16 MiB scoped default.
    vmem_bytes = 2 * 2 * tile * _LANES * 4 + 2 * r_rows * _LANES * 4 + (2 << 20)
    cparams = pltpu.CompilerParams(
        dimension_semantics=("parallel",),
        vmem_limit_bytes=max(vmem_bytes, 16 << 20))

    partials = pl.pallas_call(
        partial(_partial_sums_kernel, valid_rows=valid_rows),
        out_shape=jax.ShapeDtypeStruct((num_blocks, r_rows, _LANES), jnp.float32),
        grid_spec=pltpu.PrefetchScalarGridSpec(
            num_scalar_prefetch=0,
            grid=(num_blocks,),
            in_specs=[data_spec, data_spec],
            out_specs=out_spec),
        compiler_params=cparams,
    )(x2, t2)

    # Weight of flat position (row, lane) is w[(row*128 + lane) % C]; it is
    # periodic in row with period `period` | r_rows, so an (R, 128) pattern
    # applied to the summed partials is exact for every block.
    pat_idx = (jnp.arange(r_rows * _LANES, dtype=jnp.int32) % C).reshape(
        r_rows, _LANES)
    w_pat = w32[pat_idx]
    pos_sums = jnp.sum(partials, axis=0)              # (R, 128)
    return jnp.sum(pos_sums * w_pat) / jnp.float32(total)


if __name__ == "__main__":
    key = jax.random.PRNGKey(0)
    k1, k2, k3 = jax.random.split(key, 3)

    def make_case(n, c, ka, kb, kc):
        o = jax.random.normal(ka, (n, c), dtype=jnp.float32)                # logits
        t = (jax.random.uniform(kb, (n, c)) > 0.5).astype(jnp.float32)      # {0,1}
        w = jax.random.uniform(kc, (c,), minval=0.5, maxval=2.0).astype(jnp.float32)
        return o, t, w

    # 1) kernel path, C | 128, ragged last grid block (rows % tile != 0)
    o, t, w = make_case(200, 16, k1, k2, k3)
    loss = jax.block_until_ready(
        weighted_multilabel_loss(o, t, w, small_problem_elems=0))
    ref = jax.block_until_ready(_reference_loss(o, t, w))
    assert jnp.allclose(loss, ref, rtol=1e-5, atol=1e-6), (loss, ref)

    # 2) kernel path, general C (128 % C != 0 -> period=5, R=40), 2 blocks
    o, t, w = make_case(1024, 20, k2, k3, k1)
    loss2 = jax.block_until_ready(
        weighted_multilabel_loss(o, t, w, small_problem_elems=0))
    ref2 = jax.block_until_ready(_reference_loss(o, t, w))
    assert jnp.allclose(loss2, ref2, rtol=1e-5, atol=1e-6), (loss2, ref2)

    # 3) kernel path with bf16 inputs (halved HBM traffic, f32 accumulation)
    o, t, w = make_case(256, 16, k3, k1, k2)
    loss3 = jax.block_until_ready(
        weighted_multilabel_loss(o.astype(jnp.bfloat16),
                                 t.astype(jnp.bfloat16), w,
                                 small_problem_elems=0))
    ref3 = jax.block_until_ready(
        _reference_loss(o.astype(jnp.bfloat16), t.astype(jnp.bfloat16), w))
    assert jnp.allclose(loss3, ref3, rtol=2e-3, atol=1e-3), (loss3, ref3)

    # 4) tiny / ragged (N*C % 128 != 0) -> plain-JAX bypass (no pad copy)
    o, t, w = make_case(12, 10, k1, k3, k2)
    loss4 = jax.block_until_ready(weighted_multilabel_loss(o, t, w))
    ref4 = jax.block_until_ready(_reference_loss(o, t, w))
    assert jnp.allclose(loss4, ref4, rtol=1e-5, atol=1e-6), (loss4, ref4)

    print("KERNEL_OK")
</pallas_src>

<mosaic_0001>
module attributes {stable_mosaic.version = 11 : i64} {
  func.func @_partial_sums_kernel(%arg0: i32, %arg1: memref<16x128xf32, #tpu.memory_space<vmem>>, %arg2: memref<16x128xf32, #tpu.memory_space<vmem>>, %arg3: memref<1x8x128xf32, #tpu.memory_space<vmem>>) attributes {dimension_semantics = [#tpu.dimension_semantics<parallel>], iteration_bounds = array<i64: 2>, scalar_prefetch = 0 : i64, scratch_operands = 0 : i64, tpu.core_type = #tpu.core_type<tc>, window_params = [{transform_indices = @transform_0, window_bounds = array<i64: 16, 128>}, {transform_indices = @transform_1, window_bounds = array<i64: 16, 128>}, {transform_indices = @transform_2, window_bounds = array<i64: 1, 8, 128>}]} {
    %c0 = arith.constant 0 : index
    %c0_0 = arith.constant 0 : index
    %0 = vector.load %arg1[%c0, %c0_0] : memref<16x128xf32, #tpu.memory_space<vmem>>, vector<16x128xf32>
    %c0_1 = arith.constant 0 : index
    %c0_2 = arith.constant 0 : index
    %1 = vector.load %arg2[%c0_1, %c0_2] : memref<16x128xf32, #tpu.memory_space<vmem>>, vector<16x128xf32>
    %cst = arith.constant 0.000000e+00 : f32
    %2 = vector.broadcast %cst : f32 to vector<16x128xf32>
    %3 = arith.maximumf %0, %2 : vector<16x128xf32>
    %4 = arith.mulf %0, %1 : vector<16x128xf32>
    %5 = arith.subf %3, %4 : vector<16x128xf32>
    %6 = math.absf %0 : vector<16x128xf32>
    %cst_3 = arith.constant 0.000000e+00 : f32
    %7 = vector.broadcast %cst_3 : f32 to vector<16x128xf32>
    %8 = arith.subf %7, %6 : vector<16x128xf32>
    %9 = math.exp %8 : vector<16x128xf32>
    %10 = math.log1p %9 : vector<16x128xf32>
    %11 = arith.addf %5, %10 : vector<16x128xf32>
    %c16_i32 = arith.constant 16 : i32
    %12 = arith.muli %arg0, %c16_i32 : i32
    %13 = tpu.iota {dimensions = array<i32: 0>} : vector<16x128xi32>
    %14 = vector.broadcast %12 : i32 to vector<16x128xi32>
    %15 = arith.addi %14, %13 : vector<16x128xi32>
    %c25_i32 = arith.constant 25 : i32
    %16 = vector.broadcast %c25_i32 : i32 to vector<16x128xi32>
    %17 = arith.cmpi slt, %15, %16 : vector<16x128xi32>
    %cst_4 = arith.constant 0.000000e+00 : f32
    %18 = vector.broadcast %cst_4 : f32 to vector<16x128xf32>
    %19 = arith.select %17, %11, %18 : vector<16x128xi1>, vector<16x128xf32>
    %20 = vector.shape_cast %19 : vector<16x128xf32> to vector<2x8x128xf32>
    %cst_5 = arith.constant dense<0.000000e+00> : vector<8x128xf32>
    %21 = vector.multi_reduction <add>, %20, %cst_5 [0] : vector<2x8x128xf32> to vector<8x128xf32>
    %22 = vector.shape_cast %21 : vector<8x128xf32> to vector<1x8x128xf32>
    %c0_6 = arith.constant 0 : index
    %c0_7 = arith.constant 0 : index
    %c0_8 = arith.constant 0 : index
    %23 = vector.load %arg3[%c0_6, %c0_7, %c0_8] : memref<1x8x128xf32, #tpu.memory_space<vmem>>, vector<1x8x128xf32>
    tpu.vector_store %arg3[%c0_6, %c0_7, %c0_8], %22 {strides = array<i32>} : memref<1x8x128xf32, #tpu.memory_space<vmem>>, vector<1x8x128xf32>,
    return
  }
  func.func @transform_0(%arg0: i32) -> (i32, i32) {
    %c0_i32 = arith.constant 0 : i32
    %c0_i32_0 = arith.constant 0 : i32
    return %arg0, %c0_i32 : i32, i32
  }
  func.func @transform_1(%arg0: i32) -> (i32, i32) {
    %c0_i32 = arith.constant 0 : i32
    %c0_i32_0 = arith.constant 0 : i32
    return %arg0, %c0_i32 : i32, i32
  }
  func.func @transform_2(%arg0: i32) -> (i32, i32, i32) {
    %c0_i32 = arith.constant 0 : i32
    %c0_i32_0 = arith.constant 0 : i32
    %c0_i32_1 = arith.constant 0 : i32
    return %arg0, %c0_i32, %c0_i32_0 : i32, i32, i32
  }
}

</mosaic_0001>

<bundles_post_ra>
// kernel: tpu_custom_call.1
= control target key start
LH: loop header
LB: loop body
LE: loop exit
PB: predicated region body
PF: predicated region fallthrough
CT: control target
= control target key end

     0   :  { %7 = vsyncpa [#allocation3], 0  ;;  %s768_s0 = inlined_call_operand.hbm [shape: f32[25,128], index: 0, kind: input, shape index: {}]   ;;  %s769_s1 = inlined_call_operand.hbm [shape: f32[25,128], index: 1, kind: input, shape index: {}]   ;;  %s770_s2 = inlined_call_operand.hbm [shape: f32[2,8,128], index: 2, kind: output, shape index: {}]  }
   0x1   :  { %9 = vsyncpa [#allocation3 + $0x1], 0 }
   0x2   :  { %10 = vsyncpa [#allocation6], 0 }
   0x3   :  { %12 = vsyncpa [#allocation6 + $0x1], 0 }
   0x4   :  { %13 = vsyncpa [#allocation4], 0 }
   0x5   :  { %15 = vsyncpa [#allocation4 + $0x1], 0  ;;  %s598_s9 = smov 0   ;;  %s600_s10 = smov 0  }
   0x6   :  { %s602_s11 = smov 0   ;;  %s604_s12 = smov 0  }
   0x7 LB: > { %s619_s13 = sadd.s32 4294967295, %s579_s12   ;;  %s368_s14 = sadd.s32 4294967294, %s579_s12   ;;  %s579_s12 = sphi %s604_s12, %s781_s12   ;;  %s575_s11 = sphi %s602_s11, %s780_s11   ;;  %s571_s10 = sphi %s600_s10, %s779_s10   ;;  %s567_s9 = sphi %s598_s9, %s778_s9  }
   0x8   : > { %s623_s15 = sadd.s32 1, %s579_s12   ;;  %s28_s16 = sadd.s32 1, %s575_s11 }
   0x9   : > { %s25_s17 = ssub.s32 %s579_s12, %s623_s15  ;;  %p35_p0 = scmp.ne.s32.totalorder %s575_s11, %s571_s10 }
   0xa   : > { %p26_p1 = scmp.eq.s32.totalorder %s25_s17, 0  ;;  %p36_p2 = scmp.eq.s32.totalorder %s579_s12, 0 }
   0xb   : > { %p41_p3 = scmp.ne.s32.totalorder %s571_s10, %s567_s9  ;;  %p42_p4 = scmp.eq.s32.totalorder %s619_s13, 0 }
   0xc   : > { %s635_s18 = scalar_select %p26_p1, %s575_s11, %s28_s16  }
   0xd   : > { %p637_p5 = por %p36_p2, %p35_p0  ;;  %p641_p6 = por %p42_p4, %p41_p3 }
   0xe   : > { %p91_p7 = scmp.eq.s32.totalorder %s619_s13, 1  ;;  %p97_p8 = scmp.eq.s32.totalorder %s368_s14, 1 }
   0xf   : > { %p405_p10 = scmp.lt.s32.totalorder %s579_s12, 2  ;;  %s657_s23 = sand.u32 1, %s575_s11  }
  0x10   : > { %p648_p11 = por %p91_p7, %p35_p0  ;;  %p652_p12 = por %p97_p8, %p41_p3 }
  0x11   : > { %s386_s24 = sshll.u32 %s579_s12, 4  ;;  %s371_s25 = sshll.u32 %s657_s23, 4 }
  0x12   : > { %s126_s28 = scalar_lea.hbm %s768_s0, %s386_s24  ;;  %s121_s30 = scalar_lea.vmem [#allocation2], %s371_s25 }
  0x13   : > { %s127_s29 = sshll.u32 %s126_s28, 4  ;;  %s129_s3 = sshll.u32 %s121_s30, 4  ;;  %s128_s29 = int_to_ptr.hbm [resolvable:$true] %s127_s29  ;;  %s130_s3 = int_to_ptr.vmem [resolvable:$true] %s129_s3 }
  0x14   : > { %p670_p13 = pnand %p405_p10, %p637_p5  ;;  %p377_p0 = scmp.ge.s32.totalorder %s579_s12, 1 }
  0x15   : > { %p159_p1 = scmp.lt.s32.totalorder %s579_s12, 3  ;;  %s118_s5 = scalar_lea.sflag [#allocation3], %s657_s23 }
  0x16   : > { %s449_s6 = sshra.s32 %s128_s29, 4  ;;  %p453_p3 = pneg %p670_p13  ;;  %s450_s6 = int_to_ptr.hbm [resolvable:$true] %s449_s6 }
  0x17   : > { %s451_s7 = scalar_lea.hbm %s450_s6, 16  ;;  %s456_s16 = scalar_lea.hbm %s768_s0, 32 }
  0x18   : > { %p452_p2 = scmp.ne.s32.totalorder %s450_s6, %s451_s7  ;;  %p457_p5 = scmp.lt.s32.totalorder %s450_s6, %s768_s0 }
  0x19   : > { %p458_p8 = scmp.lt.s32.totalorder %s456_s16, %s451_s7 }
  0x1a   : > { %p454_p4 = pnand %p453_p3, %p452_p2 }
  0x1b   : > { %p459_p10 = por %p458_p8, %p457_p5 }
  0x1c   : > { %p455_p7 = pneg %p454_p4 }
  0x1e   : > { %p460_p9 = pnand %p459_p10, %p455_p7 }
  0x20   : > { %463 = shalt.err (!%p460_p9)
}
  0x21   : > { %s581_s26 = smov 128   ;;  %s582_s27 = smov 8  }
  0x22   : > { %397 = dma.hbm_to_vmem [thread:$0]  (!%p670_p13), %s128_s29, 256, %s130_s3, %s118_s5, %s581_s26, %s581_s26, %s582_s27  }
  0x23   : > { %p694_p2 = pnand %p377_p0, %p159_p1  ;;  %s148_s7 = scalar_lea.hbm %s769_s1, %s386_s24 }
  0x24   : > { %s149_s8 = sshll.u32 %s148_s7, 4  ;;  %s143_s14 = scalar_lea.vmem [#allocation5], %s371_s25  ;;  %s150_s8 = int_to_ptr.hbm [resolvable:$true] %s149_s8 }
  0x25   : > { %s151_s16 = sshll.u32 %s143_s14, 4  ;;  %s140_s17 = scalar_lea.sflag [#allocation6], %s657_s23  ;;  %s152_s16 = int_to_ptr.vmem [resolvable:$true] %s151_s16 }
  0x26   : > { %s479_s19 = sshra.s32 %s150_s8, 4  ;;  %s486_s30 = scalar_lea.hbm %s769_s1, 32  ;;  %s480_s19 = int_to_ptr.hbm [resolvable:$true] %s479_s19 }
  0x27   : > { %s481_s29 = scalar_lea.hbm %s480_s19, 16  ;;  %p487_p4 = scmp.lt.s32.totalorder %s480_s19, %s769_s1 }
  0x28   : > { %p482_p9 = scmp.ne.s32.totalorder %s480_s19, %s481_s29  ;;  %p488_p7 = scmp.lt.s32.totalorder %s486_s30, %s481_s29 }
  0x2a   : > { %p484_p0 = pnand %p482_p9, %p453_p3  ;;  %p489_p5 = por %p488_p7, %p487_p4 }
  0x2c   : > { %p485_p1 = pneg %p484_p0 }
  0x2e   : > { %p490_p8 = pnand %p489_p5, %p485_p1 }
  0x30   : > { %493 = shalt.err (!%p490_p8)
}
  0x31   : > { %400 = dma.hbm_to_vmem [thread:$0]  (!%p670_p13), %s150_s8, 256, %s152_s16, %s140_s17, %s581_s26, %s581_s26, %s582_s27  }
  0x32   : > { %163 = sbr.rel (%p694_p2) target bundleno = 93 (0x5d), region = 28  ;;  %s720_s23 = sand.u32 (!%p694_p2), 1, %s571_s10  }
  0x33   : > { %s378_s25 = sshll.u32 (!%p694_p2), %s720_s23, 4  ;;  %s166_s7 = scalar_lea.sflag (!%p694_p2), [#allocation3], %s720_s23 }
  0x34   : > { %s169_s14 = scalar_lea.vmem (!%p694_p2), [#allocation2], %s378_s25 }
  0x37   : > { %554 = dma.done.wait (%p641_p6), %s166_s7, 256  }
  0x38   : > { %556 = vsyncadd (%p641_p6), %s166_s7, 4294967040  ;;  %s176_s4 = scalar_lea.sflag [#allocation6], %s720_s23  ;;  %s179_s26 = scalar_lea.vmem [#allocation5], %s378_s25 }
  0x39   : > { %558 = dma.done.wait (%p641_p6), %s176_s4, 256  }
  0x3a   : > { %560 = vsyncadd (%p641_p6), %s176_s4, 4294967040  ;;  %v208_v0 = vld [vmem:[%s169_s14] sm:$0xff]  ;;  %v209_v1 = vld [vmem:[%s169_s14 + $0x8] sm:$0xff]  ;;  %v247_v8 = vlaneseq  ;;  %s381_s27 = sshll.u32 %s619_s13, 4  ;;  %s380_s20 = sshll.u32 %s720_s23, 3 }
  0x3b   : > { %v218_v2 = vand.u32 2147483647, %v208_v0  ;;  %v219_v3 = vand.u32 2147483647, %v209_v1  ;;  %v210_v14 = vld [vmem:[%s179_s26] sm:$0xff]  ;;  %v211_v17 = vld [vmem:[%s179_s26 + $0x8] sm:$0xff]  ;;  %v250_v20 = vstv %s381_s27 }
  0x3c   : > { %v248_v10 = vshrl.u32 %v247_v8, 7  ;;  %v212_v21 = vmax.f32 %v208_v0, 0.0  ;;  %v214_v22 = vmul.f32 %v210_v14, %v208_v0  ;;  %v213_v25 = vmax.f32 %v209_v1, 0.0  ;;  %s383_s28 = sshll.u32 %s619_s13, 3  ;;  %s205_s13 = scalar_lea.vmem [#allocation7], %s380_s20 }
  0x3d   : > { %v220_v4 = vsub.f32 0.0, %v218_v2  ;;  %v221_v5 = vsub.f32 0.0, %v219_v3  ;;  %v215_v26 = vmul.f32 %v211_v17, %v209_v1  ;;  %s270_s17 = scalar_lea.hbm %s770_s2, %s383_s28  ;;  %s272_s19 = sshll.u32 %s205_s13, 4  ;;  %s273_s19 = int_to_ptr.vmem [resolvable:$true] %s272_s19 }
  0x3e   : > { %v249_v19 = vadd.s32 8, %v248_v10  ;;  %v251_v29 = vadd.s32 %v250_v20, %v248_v10  ;;  %v216_v31 = vsub.f32 %v212_v21, %v214_v22  ;;  %s274_s29 = sshll.u32 %s270_s17, 4  ;;  %s260_s3 = scalar_lea.sflag [#allocation4], %s720_s23  ;;  %s275_s29 = int_to_ptr.hbm [resolvable:$true] %s274_s29 }
  0x3f   : > { %v222_v6 = vmul.f32 1.442695, %v220_v4  ;;  %v224_v7 = vmul.f32 1.442695, %v221_v5  ;;  %v217_v35 = vsub.f32 %v213_v25, %v215_v26  ;;  %s523_s5 = sshra.s32 %s275_s29, 4  ;;  %s529_s25 = scalar_lea.hbm %s770_s2, 16  ;;  %s524_s5 = int_to_ptr.hbm [resolvable:$true] %s523_s5 }
  0x40   : > { %v252_v33 = vadd.s32 %v250_v20, %v249_v19  ;;  %vm253_vm2 = vcmp.lt.s32.totalorder %v251_v29, 25  ;;  %s525_s30 = scalar_lea.hbm %s524_s5, 8  ;;  %p530_p10 = scmp.lt.s32.totalorder %s524_s5, %s770_s2 }
  0x41   : > { %441 = vpow2.f32 %v222_v6  ;;  %p526_p6 = scmp.ne.s32.totalorder %s524_s5, %s525_s30  ;;  %p531_p2 = scmp.lt.s32.totalorder %s529_s25, %s525_s30 }
  0x42   : > { %443 = vpow2.f32 %v224_v7  ;;  %vm254_vm3 = vcmp.lt.s32.totalorder %v252_v33, 25 }
  0x43   : > { %p527_p13 = pnand %p526_p6, %p648_p11  ;;  %p532_p9 = por %p531_p2, %p530_p10 }
  0x45   : > { %p528_p3 = pneg %p527_p13 }
  0x47   : > { %v442_v9 = vpop.eup %441  ;;  %p533_p0 = pnand %p532_p9, %p528_p3 }
  0x48   : > { %v444_v11 = vpop.eup %443  ;;  %v226_v12 = vadd.f32 1.0, %v442_v9  ;;  %v229_v13 = vmul.f32 -0.5, %v442_v9  ;;  %v232_v23 = vand.u32 2147483647, %v442_v9 }
  0x49   : > { %v235_v15 = vadd.f32 1.0, %v444_v11  ;;  %v238_v16 = vmul.f32 -0.5, %v444_v11  ;;  %v241_v27 = vand.u32 2147483647, %v444_v11 }
  0x4a   : > { %445 = vlog2.f32 %v226_v12  ;;  %v230_v18 = vadd.f32 1.0, %v229_v13  ;;  %vm233_vm0 = vcmp.lt.f32.partialorder %v232_v23, 0.0004427343 }
  0x4b   : > { %447 = vlog2.f32 %v235_v15  ;;  %v239_v24 = vadd.f32 1.0, %v238_v16  ;;  %vm242_vm1 = vcmp.lt.f32.partialorder %v241_v27, 0.0004427343 }
  0x4c   : > { %v231_v28 = vmul.f32 %v442_v9, %v230_v18 }
  0x4d   : > { %v240_v32 = vmul.f32 %v444_v11, %v239_v24 }
  0x50   : > { %v446_v30 = vpop.eup %445 }
  0x51   : > { %v448_v34 = vpop.eup %447  ;;  %v228_v36 = vmul.f32 0.6931472, %v446_v30 }
  0x52   : > { %v237_v37 = vmul.f32 0.6931472, %v448_v34 }
  0x53   : > { %v234_v38 = vsel %vm233_vm0, %v231_v28, %v228_v36 }
  0x54   : > { %v243_v39 = vsel %vm242_vm1, %v240_v32, %v237_v37  ;;  %v244_v40 = vadd.f32 %v234_v38, %v216_v31 }
  0x55   : > { %v245_v41 = vadd.f32 %v243_v39, %v217_v35 }
  0x56   : > { %v255_v42 = vsel %vm253_vm2, %v244_v40, 0.0 }
  0x57   : > { %v256_v43 = vsel %vm254_vm3, %v245_v41, 0.0 }
  0x58   : > { %v257_v44 = vadd.f32 %v256_v43, %v255_v42 }
  0x5a   : > { %258 = vst [vmem:[%s205_s13] sm:$0xff] %v257_v44 }
  0x5b   : > { %536 = shalt.err (!%p533_p0)
}
  0x5c   : > { %392 = dma.vmem_to_hbm [thread:$0]  (%p648_p11), %s273_s19, 128, %s275_s29, %s260_s3  }
  0x5d PF: > { %s286_s23 = sand.u32 1, %s567_s9   ;;  %p777_p1 = scmp.ge.s32.totalorder %s579_s12, 2 }
  0x5e   : > { %s287_s4 = scalar_lea.sflag [#allocation4], %s286_s23 }
  0x5f   : > { %p402_p4 = pnand %p777_p1, %p652_p12 }
  0x61   : > { %p403_p7 = pneg %p402_p4 }
  0x63   : > { %562 = dma.done.wait (%p403_p7), %s287_s4, 128  }
  0x64   : > { %564 = vsyncadd (%p403_p7), %s287_s4, 4294967168  ;;  %p18_p5 = scmp.ge.s32.totalorder %s623_s15, 4   ;;  %s778_s9 = smov %s571_s10 }
  0x65   : > { %s779_s10 = smov %s575_s11  ;;  %s780_s11 = smov %s635_s18 }
  0x66   : > { %s781_s12 = smov %s623_s15  ;;  %20 = sbr.rel (!%p18_p5) target bundleno = 7 (0x7), region = 86 }
  0x6b   :  { %293 = vsyncpa [#allocation3], 1 }
  0x6c   :  { %295 = vsyncpa [#allocation3 + $0x1], 1 }
  0x6d   :  { %296 = vsyncpa [#allocation6], 1 }
  0x6e   :  { %298 = vsyncpa [#allocation6 + $0x1], 1 }
  0x6f   :  { %299 = vsyncpa [#allocation4], 1 }
  0x70   :  { %301 = vsyncpa [#allocation4 + $0x1], 1 }

</bundles_post_ra>
